<compile_context>
chip_gen: v7x
topology: tpu7x:2x2x1
jax: 0.10.0
libtpu: 0.0.40
codegen_flags: <defaults>
</compile_context>

<pallas_src>
import functools

import numpy as np

import jax
import jax.numpy as jnp
from jax import lax
from jax.experimental import pallas as pl
from jax.experimental.pallas import tpu as pltpu

BN_EPS = 1e-5
N_JOINT = 21
N_COORD = 3
D_IN = N_JOINT * N_COORD          # 63  raw xyz features
D_FEAT = N_JOINT * 5              # 105 xyz + sin(x) + cos(x) (PyTorch layout)
D_K = 192                         # fused dense1 contraction dim: 3 x 64-lane blocks
D_H1 = 196
D_H1_PAD = 256                    # hidden dim padded to a lane-aligned size
D_OUT = 32


def _round_up(n, m):
    return ((n + m - 1) // m) * m


def _recog_joint_kernel(
    x_ref,                        # (TB, 63)   f32
    w1_ref,                       # (192, 256) bf16  fused dense1 weight
    b1_ref,                       # (1, 256)   f32
    w2_ref,                       # (256, 32)  bf16  (BN1 [+ optionally s2] folded)
    b2_ref,                       # (1, 32)    f32
    s2_ref,                       # (1, 32)    f32   (unused when s2 is folded)
    t2_ref,                       # (1, 32)    f32
    o_ref,                        # (TB, 32)   f32
    *, apply_s2,                  # static trace-time flag
):
    x = x_ref[...]                                        # f32 for sin/cos (EUP path)
    zcol = jnp.zeros((x.shape[0], 1), jnp.float32)
    xp = jnp.concatenate([x, zcol], axis=-1)              # (TB, 64)
    # Fused feature block [x | sin(x) | cos(x)].  Pad lanes (63/127/191) hit
    # zero weight rows, as do sin/cos of y/z coordinates, so the result equals
    # cat([x, sin(x[...,0:1]), cos(x[...,0:1])]) @ W1 for finite inputs.
    act = jnp.concatenate([xp, jnp.sin(xp), jnp.cos(xp)], axis=-1)   # (TB, 192)

    h = jnp.dot(act.astype(jnp.bfloat16), w1_ref[...],
                preferred_element_type=jnp.float32)
    h = jnp.maximum(h + b1_ref[...], 0.0)                 # ReLU; BN1 folded into w2/b2

    h2 = jnp.dot(h.astype(jnp.bfloat16), w2_ref[...],
                 preferred_element_type=jnp.float32)
    h2 = jnp.maximum(h2 + b2_ref[...], 0.0)
    if apply_s2:                                          # only when some s2 <= 0
        h2 = h2 * s2_ref[...]
    o_ref[...] = h2 + t2_ref[...]


def prepare_params(raw):
    """One-time transform of raw (PyTorch-layout) params into kernel params."""
    w1 = raw["w1"]                                        # (105, 196), x@W convention
    idx = np.arange(D_FEAT)
    xyz_rows = idx[idx % 5 < 3]                           # x,y,z rows per joint
    sin_rows = idx[idx % 5 == 3]                          # sin(x) rows
    cos_rows = idx[idx % 5 == 4]                          # cos(x) rows
    x_pos = 3 * np.arange(N_JOINT)                        # x-coord columns in 63-layout

    # Fused dense1 weight: rows [0:63]=xyz, [64:127]=sin block, [128:191]=cos
    # block; pad rows 63/127/191 and all y/z rows of the sin/cos blocks are 0.
    wf = jnp.zeros((D_K, D_H1_PAD), jnp.float32)
    wf = wf.at[0:D_IN, :D_H1].set(w1[xyz_rows])
    wf = wf.at[64 + x_pos, :D_H1].set(w1[sin_rows])
    wf = wf.at[128 + x_pos, :D_H1].set(w1[cos_rows])
    b1 = jnp.zeros((1, D_H1_PAD), jnp.float32).at[0, :D_H1].set(raw["b1"])

    # Fold eval-mode BN1 (affine) into dense2: exact.
    a1 = raw["g1"] * lax.rsqrt(raw["v1"] + BN_EPS)        # (196,)
    c1 = raw["be1"] - raw["m1"] * a1                      # (196,)
    w2f = raw["w2"] * a1[:, None]                         # (196, 32)
    b2f = raw["b2"] + c1 @ raw["w2"]                      # (32,)

    # BN2 (eval) as per-channel scale / shift.
    s2 = raw["g2"] * lax.rsqrt(raw["v2"] + BN_EPS)
    t2 = raw["be2"] - raw["m2"] * s2

    # Fold s2 into dense2 when strictly positive (relu(s2*z) == s2*relu(z)).
    fold_s2 = bool(jnp.all(s2 > 0))                       # concrete (eager) check
    if fold_s2:
        w2f = w2f * s2[None, :]
        b2f = b2f * s2

    w2p = jnp.zeros((D_H1_PAD, D_OUT), jnp.float32).at[:D_H1].set(w2f)

    bf16 = jnp.bfloat16
    return dict(
        w1=wf.astype(bf16),
        b1=b1,
        w2=w2p.astype(bf16),
        b2=b2f.reshape(1, D_OUT).astype(jnp.float32),
        s2=s2.reshape(1, D_OUT).astype(jnp.float32),
        t2=t2.reshape(1, D_OUT).astype(jnp.float32),
        apply_s2=not fold_s2,                             # static Python flag
    )


def recog_joint_forward(x, p, tile_b=2048):
    """x: (B, 21, 3) float32. Returns (B, 32) float32."""
    B = x.shape[0]
    x63 = x.reshape(B, D_IN)                              # contiguous view, no HBM pass

    # Large tile to amortize per-step overhead, but aim for >=2 grid steps when
    # B allows so both v7x TensorCores get work.  TB is kept a multiple of 8;
    # a partial final tile is handled by Pallas (out-of-range rows clipped).
    TB = min(tile_b, max(8, _round_up(pl.cdiv(B, 2), 8)))
    grid = (pl.cdiv(B, TB),)

    def const(shape):                                     # params: VMEM-resident
        return pl.BlockSpec(shape, lambda i: (0, 0))

    cost = pl.CostEstimate(
        flops=2 * B * (D_K * D_H1_PAD + D_H1_PAD * D_OUT),
        transcendentals=2 * B * 64,
        bytes_accessed=(B * D_IN * 4 + B * D_OUT * 4
                        + D_K * D_H1_PAD * 2 + D_H1_PAD * 4
                        + D_H1_PAD * D_OUT * 2 + 3 * D_OUT * 4),
    )

    kernel = functools.partial(_recog_joint_kernel, apply_s2=p["apply_s2"])

    return pl.pallas_call(
        kernel,
        out_shape=jax.ShapeDtypeStruct((B, D_OUT), jnp.float32),
        grid=grid,
        in_specs=[
            pl.BlockSpec((TB, D_IN), lambda i: (i, 0)),   # x tile
            const((D_K, D_H1_PAD)),                       # fused w1
            const((1, D_H1_PAD)),                         # b1
            const((D_H1_PAD, D_OUT)),                     # w2 (BN1/s2 folded)
            const((1, D_OUT)),                            # b2
            const((1, D_OUT)),                            # s2
            const((1, D_OUT)),                            # t2
        ],
        out_specs=pl.BlockSpec((TB, D_OUT), lambda i: (i, 0)),
        compiler_params=pltpu.CompilerParams(
            dimension_semantics=("parallel",),
            vmem_limit_bytes=32 * 1024 * 1024,            # clears v5e's 16MiB default
        ),
        cost_estimate=cost,
    )(x63, p["w1"], p["b1"], p["w2"], p["b2"], p["s2"], p["t2"])


def init_params(key):
    """Deterministic synthetic raw parameters (shapes from RecogJoint.__init__)."""
    ks = jax.random.split(key, 10)

    def unif(k, shape, bound):
        return jax.random.uniform(k, shape, jnp.float32, -bound, bound)

    # nn.Linear(105, 196): weight stored transposed as (105,196), bias (196,)
    b1_bound = 1.0 / (105.0 ** 0.5)
    w1 = unif(ks[0], (D_FEAT, D_H1), b1_bound)
    b1 = unif(ks[1], (D_H1,), b1_bound)
    # nn.Linear(196, 32)
    b2_bound = 1.0 / (196.0 ** 0.5)
    w2 = unif(ks[2], (D_H1, D_OUT), b2_bound)
    b2 = unif(ks[3], (D_OUT,), b2_bound)
    # BatchNorm1d(196) / BatchNorm1d(32): gamma, beta, running_mean, running_var
    g1 = 1.0 + 0.1 * jax.random.normal(ks[4], (D_H1,), jnp.float32)
    be1 = 0.1 * jax.random.normal(ks[5], (D_H1,), jnp.float32)
    m1 = 0.05 * jax.random.normal(ks[6], (D_H1,), jnp.float32)
    v1 = 1.0 + 0.1 * jnp.abs(jax.random.normal(ks[7], (D_H1,), jnp.float32))
    g2 = 1.0 + 0.1 * jax.random.normal(ks[8], (D_OUT,), jnp.float32)
    be2 = 0.1 * jax.random.normal(ks[9], (D_OUT,), jnp.float32)
    m2 = jnp.zeros((D_OUT,), jnp.float32)
    v2 = jnp.ones((D_OUT,), jnp.float32)
    return dict(w1=w1, b1=b1, g1=g1, be1=be1, m1=m1, v1=v1,
                w2=w2, b2=b2, g2=g2, be2=be2, m2=m2, v2=v2)


def _reference(x, p):
    """Pure-JAX f32 reference of the module forward (eval-mode BN)."""
    x0 = x[:, :, 0:1]
    xf = jnp.concatenate([x, jnp.sin(x0), jnp.cos(x0)], -1).reshape(x.shape[0], -1)
    h = jnp.maximum(xf @ p["w1"] + p["b1"], 0.0)
    h = (h - p["m1"]) / jnp.sqrt(p["v1"] + BN_EPS) * p["g1"] + p["be1"]
    h = jnp.maximum(h @ p["w2"] + p["b2"], 0.0)
    h = (h - p["m2"]) / jnp.sqrt(p["v2"] + BN_EPS) * p["g2"] + p["be2"]
    return h


if __name__ == "__main__":
    key = jax.random.PRNGKey(0)
    k_x, k_p = jax.random.split(key)
    raw = init_params(k_p)
    params = prepare_params(raw)

    # B=8: exact single tile.  B=21: two grid steps with a partial final tile
    # (exercises the out-of-range row clipping path flagged in review).
    for B in (8, 21):
        kx = jax.random.fold_in(k_x, B)
        x = jax.random.normal(kx, (B, N_JOINT, N_COORD), jnp.float32)
        out = jax.block_until_ready(recog_joint_forward(x, params))
        ref = _reference(x, raw)
        assert out.shape == (B, D_OUT)
        # bf16 matmul operands -> loosened tolerance vs the f32 reference.
        assert jnp.allclose(out, ref, atol=5e-2, rtol=5e-2), (
            f"mismatch vs JAX reference at B={B}; max abs diff = "
            f"{float(jnp.max(jnp.abs(out - ref)))}")

    print("KERNEL_OK")
</pallas_src>

<mosaic_0001>
module attributes {stable_mosaic.version = 11 : i64} {
  func.func @_recog_joint_kernel(%arg0: i32, %arg1: memref<8x63xf32, #tpu.memory_space<vmem>>, %arg2: memref<192x256xbf16, #tpu.memory_space<vmem>>, %arg3: memref<1x256xf32, #tpu.memory_space<vmem>>, %arg4: memref<256x32xbf16, #tpu.memory_space<vmem>>, %arg5: memref<1x32xf32, #tpu.memory_space<vmem>>, %arg6: memref<1x32xf32, #tpu.memory_space<vmem>>, %arg7: memref<1x32xf32, #tpu.memory_space<vmem>>, %arg8: memref<8x32xf32, #tpu.memory_space<vmem>>) attributes {dimension_semantics = [#tpu.dimension_semantics<parallel>], iteration_bounds = array<i64: 1>, scalar_prefetch = 0 : i64, scratch_operands = 0 : i64, tpu.core_type = #tpu.core_type<tc>, window_params = [{transform_indices = @transform_0, window_bounds = array<i64: 8, 63>}, {pipeline_mode = #tpu.pipeline_mode<synchronous>, transform_indices = @transform_1, window_bounds = array<i64: 192, 256>}, {pipeline_mode = #tpu.pipeline_mode<synchronous>, transform_indices = @transform_2, window_bounds = array<i64: 1, 256>}, {pipeline_mode = #tpu.pipeline_mode<synchronous>, transform_indices = @transform_3, window_bounds = array<i64: 256, 32>}, {pipeline_mode = #tpu.pipeline_mode<synchronous>, transform_indices = @transform_4, window_bounds = array<i64: 1, 32>}, {pipeline_mode = #tpu.pipeline_mode<synchronous>, transform_indices = @transform_5, window_bounds = array<i64: 1, 32>}, {pipeline_mode = #tpu.pipeline_mode<synchronous>, transform_indices = @transform_6, window_bounds = array<i64: 1, 32>}, {transform_indices = @transform_7, window_bounds = array<i64: 8, 32>}]} {
    %c0 = arith.constant 0 : index
    %c0_0 = arith.constant 0 : index
    %0 = vector.load %arg1[%c0, %c0_0] : memref<8x63xf32, #tpu.memory_space<vmem>>, vector<8x63xf32>
    %cst = arith.constant 0.000000e+00 : f32
    %1 = vector.broadcast %cst : f32 to vector<8x1xf32>
    %2 = tpu.concatenate %0, %1 in 1 : vector<8x63xf32>, vector<8x1xf32> -> vector<8x64xf32>
    %3 = math.sin %2 : vector<8x64xf32>
    %4 = math.cos %2 : vector<8x64xf32>
    %5 = tpu.concatenate %2, %3, %4 in 1 : vector<8x64xf32>, vector<8x64xf32>, vector<8x64xf32> -> vector<8x192xf32>
    %6 = arith.truncf %5 : vector<8x192xf32> to vector<8x192xbf16>
    %c0_1 = arith.constant 0 : index
    %c0_2 = arith.constant 0 : index
    %7 = vector.load %arg2[%c0_1, %c0_2] : memref<192x256xbf16, #tpu.memory_space<vmem>>, vector<192x256xbf16>
    %cst_3 = arith.constant dense<0.000000e+00> : vector<8x256xf32>
    %8 = tpu.matmul %6, %7, %cst_3 {dimension_numbers = #tpu.dot_dimension_numbers<[1], [0], [0], [1], [0, 0, 1, 1], [], []>} : vector<8x192xbf16>, vector<192x256xbf16>, vector<8x256xf32> -> vector<8x256xf32>
    %c0_4 = arith.constant 0 : index
    %c0_5 = arith.constant 0 : index
    %9 = vector.load %arg3[%c0_4, %c0_5] : memref<1x256xf32, #tpu.memory_space<vmem>>, vector<1x256xf32>
    %10 = vector.broadcast %9 : vector<1x256xf32> to vector<8x256xf32>
    %11 = arith.addf %8, %10 : vector<8x256xf32>
    %cst_6 = arith.constant 0.000000e+00 : f32
    %12 = vector.broadcast %cst_6 : f32 to vector<8x256xf32>
    %13 = arith.maximumf %11, %12 : vector<8x256xf32>
    %14 = arith.truncf %13 : vector<8x256xf32> to vector<8x256xbf16>
    %c0_7 = arith.constant 0 : index
    %c0_8 = arith.constant 0 : index
    %15 = vector.load %arg4[%c0_7, %c0_8] : memref<256x32xbf16, #tpu.memory_space<vmem>>, vector<256x32xbf16>
    %cst_9 = arith.constant dense<0.000000e+00> : vector<8x32xf32>
    %16 = tpu.matmul %14, %15, %cst_9 {dimension_numbers = #tpu.dot_dimension_numbers<[1], [0], [0], [1], [0, 0, 1, 1], [], []>} : vector<8x256xbf16>, vector<256x32xbf16>, vector<8x32xf32> -> vector<8x32xf32>
    %c0_10 = arith.constant 0 : index
    %c0_11 = arith.constant 0 : index
    %17 = vector.load %arg5[%c0_10, %c0_11] : memref<1x32xf32, #tpu.memory_space<vmem>>, vector<1x32xf32>
    %18 = vector.broadcast %17 : vector<1x32xf32> to vector<8x32xf32>
    %19 = arith.addf %16, %18 : vector<8x32xf32>
    %cst_12 = arith.constant 0.000000e+00 : f32
    %20 = vector.broadcast %cst_12 : f32 to vector<8x32xf32>
    %21 = arith.maximumf %19, %20 : vector<8x32xf32>
    %c0_13 = arith.constant 0 : index
    %c0_14 = arith.constant 0 : index
    %22 = vector.load %arg7[%c0_13, %c0_14] : memref<1x32xf32, #tpu.memory_space<vmem>>, vector<1x32xf32>
    %23 = vector.broadcast %22 : vector<1x32xf32> to vector<8x32xf32>
    %24 = arith.addf %21, %23 : vector<8x32xf32>
    %c0_15 = arith.constant 0 : index
    %c0_16 = arith.constant 0 : index
    %25 = vector.load %arg8[%c0_15, %c0_16] : memref<8x32xf32, #tpu.memory_space<vmem>>, vector<8x32xf32>
    tpu.vector_store %arg8[%c0_15, %c0_16], %24 {strides = array<i32>} : memref<8x32xf32, #tpu.memory_space<vmem>>, vector<8x32xf32>,
    return
  }
  func.func @transform_0(%arg0: i32) -> (i32, i32) {
    %c0_i32 = arith.constant 0 : i32
    %c0_i32_0 = arith.constant 0 : i32
    return %arg0, %c0_i32 : i32, i32
  }
  func.func @transform_1(%arg0: i32) -> (i32, i32) {
    %c0_i32 = arith.constant 0 : i32
    %c0_i32_0 = arith.constant 0 : i32
    %c0_i32_1 = arith.constant 0 : i32
    return %c0_i32, %c0_i32_0 : i32, i32
  }
  func.func @transform_2(%arg0: i32) -> (i32, i32) {
    %c0_i32 = arith.constant 0 : i32
    %c0_i32_0 = arith.constant 0 : i32
    %c0_i32_1 = arith.constant 0 : i32
    return %c0_i32, %c0_i32_0 : i32, i32
  }
  func.func @transform_3(%arg0: i32) -> (i32, i32) {
    %c0_i32 = arith.constant 0 : i32
    %c0_i32_0 = arith.constant 0 : i32
    %c0_i32_1 = arith.constant 0 : i32
    return %c0_i32, %c0_i32_0 : i32, i32
  }
  func.func @transform_4(%arg0: i32) -> (i32, i32) {
    %c0_i32 = arith.constant 0 : i32
    %c0_i32_0 = arith.constant 0 : i32
    %c0_i32_1 = arith.constant 0 : i32
    return %c0_i32, %c0_i32_0 : i32, i32
  }
  func.func @transform_5(%arg0: i32) -> (i32, i32) {
    %c0_i32 = arith.constant 0 : i32
    %c0_i32_0 = arith.constant 0 : i32
    %c0_i32_1 = arith.constant 0 : i32
    return %c0_i32, %c0_i32_0 : i32, i32
  }
  func.func @transform_6(%arg0: i32) -> (i32, i32) {
    %c0_i32 = arith.constant 0 : i32
    %c0_i32_0 = arith.constant 0 : i32
    %c0_i32_1 = arith.constant 0 : i32
    return %c0_i32, %c0_i32_0 : i32, i32
  }
  func.func @transform_7(%arg0: i32) -> (i32, i32) {
    %c0_i32 = arith.constant 0 : i32
    %c0_i32_0 = arith.constant 0 : i32
    return %arg0, %c0_i32 : i32, i32
  }
}

</mosaic_0001>

<bundles_post_ra>
// kernel: tpu_custom_call.1
= control target key start
LH: loop header
LB: loop body
LE: loop exit
PB: predicated region body
PF: predicated region fallthrough
CT: control target
= control target key end

     0   :  { %12 = vsyncpa [#allocation3], 0  ;;  %s1031_s0 = inlined_call_operand.vmem [shape: f32[8,63], index: 0, kind: input, shape index: {}]   ;;  %s1032_s1 = inlined_call_operand.hbm [shape: bf16[192,256], index: 1, kind: input, shape index: {}]   ;;  %s1033_s2 = inlined_call_operand.vmem [shape: f32[1,256], index: 2, kind: input, shape index: {}]   ;;  %s1034_s3 = inlined_call_operand.vmem [shape: bf16[256,32], index: 3, kind: input, shape index: {}]   ;;  %s1035_s4 = inlined_call_operand.vmem [shape: f32[1,32], index: 4, kind: input, shape index: {}]   ;;  %s1036_s5 = inlined_call_operand.vmem [shape: f32[1,32], index: 5, kind: input, shape index: {}]   ;;  %s1037_s6 = inlined_call_operand.vmem [shape: f32[1,32], index: 6, kind: input, shape index: {}]   ;;  %s1038_s7 = inlined_call_operand.hbm [shape: f32[8,32], index: 7, kind: output, shape index: {}]  }
   0x1   :  { %13 = vsyncpa [#allocation4], 0  ;;  %s857_s24 = smov [#allocation2]   ;;  %s809_s28 = scalar_lea.hbm %s1032_s1, 3072 }
   0x2   :  { %s21_s25 = sshll.u32 %s857_s24, 4  ;;  %p810_p0 = scmp.ne.s32.totalorder %s1032_s1, %s809_s28  ;;  %s22_s25 = int_to_ptr.vmem [resolvable:$true] %s21_s25 }
   0x3   :  { %p813_p1 = scmp.lt.u32.totalorder %s809_s28, %s1032_s1 }
   0x5   :  { %p815_p2 = pnand %p813_p1, %p810_p0 }
   0x7   :  { %818 = shalt.err (!%p815_p2)
}
   0x8   :  { %s819_s9 = scalar_lea.vmem %s22_s25, 3072  ;;  %p824_p4 = scmp.lt.s32.totalorder %s22_s25, %s22_s25 }
   0x9   :  { %p820_p3 = scmp.ne.s32.totalorder %s22_s25, %s819_s9  ;;  %p825_p5 = scmp.lt.s32.totalorder %s819_s9, %s819_s9 }
   0xb   :  { %p826_p6 = por %p825_p5, %p824_p4 }
   0xd   :  { %p827_p7 = pnand %p826_p6, %p820_p3 }
   0xf   :  { %830 = shalt.err (!%p827_p7)
}
  0x10   :  { %s858_s10 = smov 128   ;;  %s859_s11 = smov 8  }
  0x11   :  { %27 = dma.hbm_to_vmem [thread:$0]  %s1032_s1, 3072, %s22_s25, [#allocation3], %s858_s10, %s858_s10, %s859_s11  }
  0x12   :  { %853 = dma.done.wait [#allocation3], 3072  }
  0x13   :  { %854 = vsyncadd [#allocation3], 4294964224  ;;  %vm43_vm0 = vcmask 515072   ;;  %v42_v0 = vld [vmem:[%s1031_s0] sm:$0xff]  ;;  %v756_v6 = vld [vmem:[#allocation2 + $0x14] ss:$8 sps:$4 sm:$0xff]  }
  0x14   :  { %v923_v1 = vsel %vm43_vm0, %v42_v0, 0.0  ;;  %v753_v2 = vld [vmem:[#allocation2 + $0x4] ss:$8 sps:$4 sm:$0xff]   ;;  %v755_v3 = vld [vmem:[#allocation2] ss:$8 sps:$4 sm:$0xff]   ;;  %s866_s28 = smov 64  }
  0x15   :  { %v45_v4 = vand.u32 2147483647, %v923_v1  ;;  %v48_v5 = vand.u32 2139095040, %v923_v1  ;;  %419 = vmatprep.subr.bf16.mxu0 %v753_v2  ;;  %v758_v8 = vld [vmem:[#allocation2 + $0x10] ss:$8 sps:$4 sm:$0xff]   ;;  %vm47_vm8 = vcmp.lt.s32.totalorder %v923_v1, 0  ;;  %vm137_vm0 = vweird.f32 %v923_v1 }
  0x16   :  { %420 = vmatpush1.bf16.msra.mxu0 %v755_v3  ;;  %v759_v10 = vld [vmem:[#allocation2 + $0x24] ss:$8 sps:$4 sm:$0xff]   ;;  %v761_v13 = vld [vmem:[#allocation2 + $0x20] ss:$8 sps:$4 sm:$0xff]   ;;  %v762_v15 = vld [vmem:[#allocation2 + $0x34] ss:$8 sps:$4 sm:$0xff]  }
  0x17   :  { %v49_v7 = vshrl.u32 %v48_v5, 23  ;;  %v52_v9 = vand.u32 8388607, %v45_v4  ;;  %421 = vmatprep.subr.bf16.mxu0 %v756_v6  ;;  %v764_v19 = vld [vmem:[#allocation2 + $0x30] ss:$8 sps:$4 sm:$0xff]   ;;  %s867_s25 = smov [#allocation5]  }
  0x18   :  { %v765_v21 = vld [vmem:[#allocation2 + $0x44] ss:$8 sps:$4 sm:$0xff]   ;;  %v860_v23 = vmov 683565275   ;;  %v861_v25 = vmov 2475754826  }
  0x19   :  { %v665_v11 = vadd.s32 4294967169, %v49_v7  ;;  %v53_v14 = vor.u32 8388608, %v52_v9  ;;  %v862_v27 = vmov 2131351028   ;;  %v863_v29 = vmov 2102212464  }
  0x1a   :  { %422 = vmatpush1.bf16.msra.mxu0 %v758_v8  ;;  %v864_v31 = vmov 920167782   ;;  %v767_v33 = vld [vmem:[#allocation2 + $0x40] ss:$8 sps:$4 sm:$0xff]   ;;  %v768_v38 = vld [vmem:[#allocation2 + $0x54] ss:$8 sps:$4 sm:$0xff]  }
  0x1b   :  { %v55_v12 = vadd.s32 1, %v665_v11  ;;  %423 = vmatprep.subr.bf16.mxu0 %v759_v10  ;;  %v929_v20 = vshll.u32 %v53_v14, 8  ;;  %v865_v40 = vmov 1326507024   ;;  %v770_v45 = vld [vmem:[#allocation2 + $0x50] ss:$8 sps:$4 sm:$0xff]  }
  0x1c   :  { %v771_v48 = vld [vmem:[#allocation2 + $0x64] ss:$8 sps:$4 sm:$0xff]   ;;  %v773_v58 = vld [vmem:[#allocation2 + $0x60] ss:$8 sps:$4 sm:$0xff]   ;;  %v774_v62 = vld [vmem:[#allocation2 + $0x74] ss:$8 sps:$4 sm:$0xff]  }
  0x1d   :  { %vm56_vm1 = vcmp.gt.s32.totalorder %v55_v12, 0  ;;  %v776_v5 = vld [vmem:[#allocation2 + $0x70] ss:$8 sps:$4 sm:$0xff]   ;;  %v777_v8 = vld [vmem:[#allocation2 + $0x84] ss:$8 sps:$4 sm:$0xff]   ;;  %s656_s26 = sshll.u32 %s867_s25, 4  ;;  %s657_s26 = int_to_ptr.vmem [resolvable:$true] %s656_s26 }
  0x1e   :  { %v57_v16 = vsel %vm56_vm1, %v55_v12, 0  ;;  %424 = vmatpush1.bf16.msra.mxu0 %v761_v13  ;;  %v779_v11 = vld [vmem:[#allocation2 + $0x80] ss:$8 sps:$4 sm:$0xff]   ;;  %v780_v13 = vld [vmem:[#allocation2 + $0x94] ss:$8 sps:$4 sm:$0xff]   ;;  %vm256_vm1 = vcmask 523264   ;;  %p836_p9 = scmp.lt.s32.totalorder %s657_s26, %s657_s26 }
  0x1f   :  { %v58_v17 = vshrl.u32 %v57_v16, 5  ;;  %v59_v18 = vand.u32 31, %v57_v16  ;;  %425 = vmatprep.subr.bf16.mxu0 %v762_v15  ;;  %v782_v15 = vld [vmem:[#allocation2 + $0x90] ss:$8 sps:$4 sm:$0xff]   ;;  %vm46_vm9 = vcmp.le.f32.partialorder %v45_v4, 0.7853982 }
  0x20   :  { %v790_v4 = vld [vmem:[%s1034_s3] sm:$0xff]   ;;  %s831_s27 = scalar_lea.vmem %s657_s26, 128 }
  0x21   :  { %v60_v22 = vsub.s32 32, %v59_v18  ;;  %v62_v24 = vshll.u32 %v860_v23, %v59_v18  ;;  %v65_v26 = vshll.u32 %v861_v25, %v59_v18  ;;  %v68_v28 = vshll.u32 %v862_v27, %v59_v18  ;;  %p832_p8 = scmp.ne.s32.totalorder %s657_s26, %s831_s27  ;;  %p837_p10 = scmp.lt.s32.totalorder %s831_s27, %s831_s27 }
  0x22   :  { %v71_v30 = vshll.u32 %v863_v29, %v59_v18  ;;  %v74_v32 = vshll.u32 %v864_v31, %v59_v18  ;;  %vm77_vm2 = vcmp.lt.s32.totalorder %v58_v17, 1  ;;  %vm78_vm3 = vcmp.lt.s32.totalorder %v58_v17, 2  ;;  %426 = vmatpush1.bf16.msra.mxu0 %v764_v19  ;;  %v785_v19 = vld [vmem:[#allocation2 + $0xa0] ss:$8 sps:$4 sm:$0xff]  }
  0x23   :  { %v61_v34 = vshrl.u32 %v860_v23, %v60_v22  ;;  %v63_v35 = vshrl.u32 %v861_v25, %v60_v22  ;;  %v66_v36 = vshrl.u32 %v862_v27, %v60_v22  ;;  %v69_v37 = vshrl.u32 %v863_v29, %v60_v22  ;;  %427 = vmatprep.subr.bf16.mxu0 %v765_v21  ;;  %p838_p11 = por %p837_p10, %p836_p9 }
  0x24   :  { %v72_v39 = vshrl.u32 %v864_v31, %v60_v22  ;;  %v75_v41 = vshrl.u32 %v865_v40, %v60_v22  ;;  %vm79_vm4 = vcmp.lt.s32.totalorder %v58_v17, 3  ;;  %vm80_vm5 = vcmp.lt.s32.totalorder %v58_v17, 4  ;;  %v783_v17 = vld [vmem:[#allocation2 + $0xa4] ss:$8 sps:$4 sm:$0xff]  }
  0x25   :  { %v64_v42 = vor.u32 %v63_v35, %v62_v24  ;;  %v67_v43 = vor.u32 %v66_v36, %v65_v26  ;;  %v70_v44 = vor.u32 %v69_v37, %v68_v28  ;;  %p839_p12 = pnand %p838_p11, %p832_p8 }
  0x26   :  { %v73_v46 = vor.u32 %v72_v39, %v71_v30  ;;  %v76_v47 = vor.u32 %v75_v41, %v74_v32  ;;  %428 = vmatpush1.bf16.msra.mxu0 %v767_v33 }
  0x27   :  { %v81_v49 = vsel %vm77_vm2, %v61_v34, %v64_v42  ;;  %v82_v50 = vsel %vm80_vm5, %v70_v44, 2102212464  ;;  %v85_v51 = vsel %vm77_vm2, %v64_v42, %v67_v43  ;;  %v89_v52 = vsel %vm77_vm2, %v67_v43, %v70_v44  ;;  %429 = vmatprep.subr.bf16.mxu0 %v768_v38 }
  0x28   :  { %v83_v53 = vsel %vm79_vm4, %v67_v43, %v82_v50  ;;  %v86_v54 = vsel %vm80_vm5, %v73_v46, 920167782  ;;  %v90_v55 = vsel %vm80_vm5, %v76_v47, 1326507024  ;;  %v786_v43 = vld [vmem:[#allocation2 + $0xb4] ss:$8 sps:$4 sm:$0xff]  }
  0x29   :  { %v87_v56 = vsel %vm79_vm4, %v70_v44, %v86_v54  ;;  %v91_v57 = vsel %vm79_vm4, %v73_v46, %v90_v55  ;;  %v84_v59 = vsel %vm78_vm3, %v81_v49, %v83_v53  ;;  %v791_v49 = vld [vmem:[%s1034_s3 + $0x48] sm:$0xff]   ;;  %v793_v54 = vld [vmem:[%s1034_s3 + $0x50] sm:$0xff]   ;;  %vm648_vm2 = vcmask 261120  }
  0x2a   :  { %v88_v60 = vsel %vm78_vm3, %v85_v51, %v87_v56  ;;  %v92_v61 = vsel %vm78_vm3, %v89_v52, %v91_v57  ;;  %430 = vmatpush1.bf16.msra.mxu0 %v770_v45  ;;  %v100_v6 = vmul.u32 %v929_v20, %v84_v59  ;;  %v788_v45 = vld [vmem:[#allocation2 + $0xb0] ss:$8 sps:$4 sm:$0xff]   ;;  %v792_v51 = vld [vmem:[%s1034_s3 + $0x8] sm:$0xff]  }
  0x2b   :  { %v944_v63 = vmul.u32.u64.low %v929_v20, %v92_v61  ;;  %v945_v0 = vmul.u32.u64.high %v929_v20, %v92_v61, %v944_v63  ;;  %v948_v2 = vmul.u32.u64.low %v929_v20, %v88_v60  ;;  %v949_v3 = vmul.u32.u64.high %v929_v20, %v88_v60, %v948_v2  ;;  %431 = vmatprep.subr.bf16.mxu0 %v771_v48  ;;  %v789_v48 = vld [vmem:[%s1034_s3 + $0x40] sm:$0xff]   ;;  %v794_v60 = vld [vmem:[%s1034_s3 + $0x10] sm:$0xff]  }
  0x2c   :  { %716 = vmatprep.subr.bf16.mxu1 %v789_v48  ;;  %v795_v63 = vld [vmem:[%s1034_s3 + $0x58] sm:$0xff]  }
  0x2d   :  { %vm102_vm6 = vc.u32 %v945_v0, %v948_v2  ;;  %v103_v7 = vadd.s32 1, %v949_v3  ;;  %v101_v24 = vadd.s32 %v948_v2, %v945_v0  ;;  %717 = vmatpush3.bf16.msra.mxu1 %v790_v4 }
  0x2e   :  { %432 = vmatpush1.bf16.msra.mxu0 %v773_v58  ;;  %718 = vmatprep.subr.bf16.mxu1 %v791_v49 }
  0x2f   :  { %433 = vmatprep.subr.bf16.mxu0 %v774_v62  ;;  %v104_v9 = vsel %vm102_vm6, %v103_v7, %v949_v3  ;;  %v798_v7 = vld [vmem:[%s1034_s3 + $0x20] sm:$0xff]  }
  0x30   :  { %v105_v10 = vadd.s32 %v104_v9, %v100_v6  ;;  %v797_v6 = vld [vmem:[%s1034_s3 + $0x60] sm:$0xff]   ;;  %v800_v9 = vld [vmem:[%s1034_s3 + $0x28] sm:$0xff]  }
  0x31   :  { %719 = vmatpush3.bf16.msra.mxu1 %v792_v51 }
  0x32   :  { %434 = vmatpush1.bf16.msra.mxu0 %v776_v5  ;;  %v106_v12 = vadd.s32 536870912, %v105_v10  ;;  %720 = vmatprep.subr.bf16.mxu1 %v793_v54  ;;  %v796_v5 = vld [vmem:[%s1034_s3 + $0x18] sm:$0xff]  }
  0x33   :  { %435 = vmatprep.subr.bf16.mxu0 %v777_v8  ;;  %v799_v8 = vld [vmem:[%s1034_s3 + $0x68] sm:$0xff]  }
  0x34   :  { %v107_v14 = vshrl.u32 %v106_v12, 30 }
  0x35   :  { %721 = vmatpush3.bf16.msra.mxu1 %v794_v60 }
  0x36   :  { %436 = vmatpush1.bf16.msra.mxu0 %v779_v11  ;;  %v108_v16 = vshll.u32 %v107_v14, 30  ;;  %v131_v36 = vsub.s32 4, %v107_v14  ;;  %722 = vmatprep.subr.bf16.mxu1 %v795_v63 }
  0x37   :  { %437 = vmatprep.subr.bf16.mxu0 %v780_v13  ;;  %v801_v13 = vld [vmem:[%s1034_s3 + $0x70] sm:$0xff]  }
  0x38   :  { %v109_v18 = vsub.s32 %v105_v10, %v108_v16  ;;  %v132_v39 = vsel %vm47_vm8, %v131_v36, %v107_v14  ;;  %v802_v14 = vld [vmem:[%s1034_s3 + $0x30] sm:$0xff]   ;;  %v286_v16 = vlaneseq }
  0x39   :  { %v134_v42 = vsel %vm46_vm9, 0, %v132_v39  ;;  %723 = vmatpush3.bf16.msra.mxu1 %v796_v5 }
  0x3a   :  { %438 = vmatpush1.bf16.msra.mxu0 %v782_v15  ;;  %v111_v20 = vsub.s32 0, %v109_v18  ;;  %v138_v44 = vadd.s32 3, %v134_v42  ;;  %v242_v47 = vand.u32 3, %v134_v42  ;;  %724 = vmatprep.subr.bf16.mxu1 %v797_v6  ;;  %v803_v15 = vld [vmem:[%s1034_s3 + $0x78] sm:$0xff]  }
  0x3b   :  { %439 = vmatprep.subr.bf16.mxu0 %v783_v17  ;;  %v287_v17 = vshrl.u32 %v286_v16, 7 }
  0x3c   :  { %v666_v21 = vmin.u32 %v111_v20, %v109_v18  ;;  %v139_v46 = vand.u32 3, %v138_v44  ;;  %vm247_vm11 = vcmp.eq.s32.totalorder %v242_v47, 2  ;;  %vm244_vm13 = vcmp.eq.s32.totalorder %v242_v47, 0 }
  0x3d   :  { %vm243_vm15 = vcmp.lt.s32.totalorder %v242_v47, 2  ;;  %725 = vmatpush3.bf16.msra.mxu1 %v798_v7  ;;  %v292_v20 = vsub.s32 1, %v287_v17 }
  0x3e   :  { %440 = vmatpush1.bf16.msra.mxu0 %v785_v19  ;;  %v113_v22 = vclz %v666_v21  ;;  %vm144_vm10 = vcmp.eq.s32.totalorder %v139_v46, 2  ;;  %vm141_vm12 = vcmp.eq.s32.totalorder %v139_v46, 0  ;;  %vm140_vm14 = vcmp.lt.s32.totalorder %v139_v46, 2  ;;  %726 = vmatprep.subr.bf16.mxu1 %v799_v8  ;;  %v284_v19 = vld [vmem:[%s1033_s2] sm:$0x3] }
  0x3f   :  { %441 = vmatprep.subr.bf16.mxu0 %v786_v43 }
  0x40   :  { %v667_v23 = vadd.s32 4294967294, %v113_v22  ;;  %v293_v22 = vrot.slane %v284_v19, %v292_v20 }
  0x41   :  { %727 = vmatpush3.bf16.msra.mxu1 %v800_v9 }
  0x42   :  { %vm668_vm7 = vcmp.lt.s32.totalorder %v667_v23, 0  ;;  %442 = vmatpush1.bf16.msra.mxu0 %v788_v45  ;;  %728 = vmatprep.subr.bf16.mxu1 %v801_v13 }
  0x43   :  { %v116_v25 = vsel %vm668_vm7, 0, %v667_v23 }
  0x44   :  { %v117_v26 = vsub.s32 32, %v116_v25  ;;  %v118_v27 = vshll.u32 %v109_v18, %v116_v25  ;;  %v121_v28 = vsub.s32 4294967266, %v116_v25  ;;  %v288_v18 = vsub.s32 0, %v287_v17 }
  0x45   :  { %729 = vmatpush3.bf16.msra.mxu1 %v802_v14 }
  0x46   :  { %v119_v29 = vshrl.u32 %v101_v24, %v117_v26  ;;  %v122_v30 = vadd.s32 127, %v121_v28  ;;  %730 = vmatprep.subr.bf16.mxu1 %v803_v15  ;;  %v289_v21 = vrot.slane %v284_v19, %v288_v18 }
  0x48   :  { %v120_v31 = vor.u32 %v119_v29, %v118_v27  ;;  %v123_v32 = vshll.u32 %v122_v30, 23 }
  0x4a   :  { %v124_v33 = vor.u32 4788187, %v123_v32  ;;  %v127_v34 = vcvt.s32.f32 %v120_v31 }
  0x4c   :  { %v125_v35 = vand.u32 2147483647, %v124_v33 }
  0x4e   :  { %v128_v37 = vmul.f32 %v127_v34, %v125_v35  ;;  %v698_v34 = vld [vmem:[%s1035_s4] ss:$0 sm:$0xff] }
  0x50   :  { %v129_v38 = vxor.u32 2147483648, %v128_v37 }
  0x52   :  { %v130_v40 = vsel %vm47_vm8, %v129_v38, %v128_v37 }
  0x53   :  { %v133_v41 = vsel %vm46_vm9, %v923_v1, %v130_v40  ;;  %v715_v40 = vld [vmem:[%s1037_s6] ss:$0 sm:$0xff] }
  0x54   :  { %805 = vcosq.f32 %v133_v41 }
  0x55   :  { %807 = vsinq.f32 %v133_v41 }
  0x5e   :  { %v806_v50 = vpop.eup %805 }
  0x5f   :  { %v808_v52 = vpop.eup %807  ;;  %v145_v53 = vxor.u32 2147483648, %v806_v50 }
  0x60   :  { %v142_v55 = vxor.u32 2147483648, %v808_v52 }
  0x61   :  { %v146_v56 = vsel %vm144_vm10, %v145_v53, %v808_v52  ;;  %v249_v57 = vsel %vm247_vm11, %v145_v53, %v808_v52 }
  0x62   :  { %v143_v58 = vsel %vm141_vm12, %v806_v50, %v142_v55  ;;  %v246_v59 = vsel %vm244_vm13, %v806_v50, %v142_v55 }
  0x63   :  { %v147_v61 = vsel %vm140_vm14, %v143_v58, %v146_v56  ;;  %v250_v62 = vsel %vm243_vm15, %v246_v59, %v249_v57 }
  0x64   :  { %v148_v0 = vsel %vm137_vm0, nan, %v147_v61  ;;  %v251_v2 = vsel %vm137_vm0, nan, %v250_v62 }
  0x65   :  { %253 = vrot.lane.b32.xlu0 %v148_v0, %s866_s28  ;;  %v259_v3 = vpack.c.bf16 %v251_v2, %v251_v2 }
  0x67   :  { %697 = vmatprep.mubr.msk.bf16.mxu0 %vm256_vm1, %v259_v3 }
  0xd7   :  { %v254_v10 = vpop.permute.xlu0 %253 }
  0xd8   :  { %v257_v11 = vsel %vm256_vm1, %v923_v1, %v254_v10  ;;  %v804_v1 = vld [vmem:[%s1034_s3 + $0x38] sm:$0xff]  }
  0xd9   :  { %v258_v12 = vpack.c.bf16 %v257_v11, %v257_v11  ;;  %731 = vmatpush3.bf16.msra.mxu1 %v804_v1 }
  0xdb   :  { %452 = vmatmul.mubr.bf16.vlgmr.msra.gmra.mrb[0].mxu0 %v258_v12 }
 0x1ae   :  { %v453_v23 = vpop.f32.mrb[0].mxu0 }
 0x1af   :  { %v454_v24 = vadd.f32 %v453_v23, %v289_v21  ;;  %v455_v25 = vpop.f32.mrb[1].mxu0 }
 0x1b0   :  { %v456_v26 = vadd.f32 %v455_v25, %v293_v22  ;;  %v457_v27 = vpop.f32.mrb[2].mxu0 }
 0x1b1   :  { %v460_v28 = vmax.f32 %v454_v24, 0.0  ;;  %v458_v29 = vpop.f32.mrb[3].mxu0 }
 0x1b2   :  { %v461_v30 = vmax.f32 %v456_v26, 0.0 }
 0x1b3   :  { %v462_v32 = vpack.c.bf16 %v460_v28, %v460_v28 }
 0x1b4   :  { %v463_v31 = vpack.c.bf16 %v461_v30, %v461_v30 }
 0x1b6   :  { %631 = vmatprep.mubr.bf16.mxu1 %v463_v31 }
 0x1b7   :  { %632 = vmatmul.mubr.bf16.vlgmr.msra.gmra.mrb[0].mxu1 %v462_v32 }
 0x28a   :  { %v732_v33 = vpop.f32.mrb[0].mxu1 }
 0x28b   :  { %v733_v35 = vpop.f32.mrb[1].mxu1 }
 0x28c   :  { %v734_v36 = vadd.f32 %v733_v35, %v732_v33  ;;  %v735_v37 = vpop.f32.mrb[2].mxu1 }
 0x28d   :  { %v736_v38 = vpop.f32.mrb[3].mxu1 }
 0x28e   :  { %v634_v39 = vadd.f32 %v734_v36, %v698_v34 }
 0x290   :  { %v639_v41 = vmax.f32 %v634_v39, 0.0 }
 0x292   :  { %v647_v42 = vadd.f32 %v715_v40, %v639_v41 }
 0x294   :  { %649 = vst.msk [vmem:[#allocation5] sm:$0xff] %vm648_vm2, %v647_v42 }
 0x295   :  { %842 = shalt.err (!%p839_p12)
}
 0x296   :  { %s843_s29 = scalar_lea.hbm %s1038_s7, 128 }
 0x297   :  { %p844_p13 = scmp.ne.s32.totalorder %s1038_s7, %s843_s29  ;;  %p847_p0 = scmp.lt.u32.totalorder %s843_s29, %s1038_s7 }
 0x299   :  { %p849_p1 = pnand %p847_p0, %p844_p13 }
 0x29b   :  { %852 = shalt.err (!%p849_p1)
}
 0x29c   :  { %659 = dma.vmem_to_hbm [thread:$0]  %s657_s26, 128, %s1038_s7, [#allocation4]  }
 0x29d   :  { %855 = dma.done.wait [#allocation4], 128  }
 0x29e   :  { %856 = vsyncadd [#allocation4], 4294967168 }
 0x29f   :  { %663 = vsyncpa [#allocation3], 1 }
 0x2a0   :  { %664 = vsyncpa [#allocation4], 1 }

</bundles_post_ra>
